<compile_context>
chip_gen: v7x
topology: tpu7x:2x2x1
jax: 0.10.0
libtpu: 0.0.40
codegen_flags: <defaults>
</compile_context>

<pallas_src>
import jax
import jax.numpy as jnp
from jax.experimental import pallas as pl
from jax.experimental.pallas import tpu as pltpu

# Whole-array (grid-less) path is used up to this many parameter elements:
# 1M f32 elements = 4 MiB per buffer, comfortably inside VMEM on all chips.
_SMALL_PARAM_ELEMS = 1 << 20
# Tiled path: target ~2 MiB (f32) per input/output buffer.
_TILE_TARGET_ELEMS = 512 * 1024


def _softplus(x):
    # Matches torch.nn.functional.softplus(x, beta=1, threshold=20):
    #   x              if x > 20
    #   log1p(exp(x))  otherwise
    # The inner clamp keeps exp() finite in the discarded branch.
    return jnp.where(x > 20.0, x, jnp.log1p(jnp.exp(jnp.minimum(x, 20.0))))


def softplus_kernel(p_ref, out_ref):
    # p_ref / out_ref: identical-shaped VMEM tiles of the stddev parameter.
    p = p_ref[...].astype(jnp.float32)
    out_ref[...] = _softplus(p).astype(out_ref.dtype)


def per_option_std_gaussian_forward(x, stddev_param, *, tile_rows=None):
    """Forward of PerOptionStdGaussianDist.

    Returns (mean, scale) describing the Normal policy:
      mean  : (B, O, A) == x  (identity pass-through, no kernel traffic)
      scale : (O, A)    == softplus(stddev_param); Normal broadcasts it
                           against mean, so no (B, O, A) materialization.
    `tile_rows` forces the tiled path (testing / very large parameters).
    """
    B, O, A = x.shape
    assert stddev_param.shape == (O, A)
    n = O * A
    itemsize = jnp.dtype(stddev_param.dtype).itemsize

    if tile_rows is None and n <= _SMALL_PARAM_ELEMS:
        # ---- grid-less whole-array call: single DMA in, compute, DMA out ----
        scale = pl.pallas_call(
            softplus_kernel,
            out_shape=jax.ShapeDtypeStruct((O, A), stddev_param.dtype),
        )(stddev_param)
    else:
        # ---- tiled path for genuinely large parameters ----------------------
        # Block = (tile_rows, A): last dim equals the full array dim and
        # tile_rows is a multiple of 8 (or the full O), so the (8,128) rule is
        # satisfied.  The grid uses cdiv; the last block may be partial, which
        # Pallas masks automatically — no whole-tile padding, no extra HBM.
        if tile_rows is None:
            tile_rows = min(O, max(8, (_TILE_TARGET_ELEMS // max(A, 1)) // 8 * 8))
        grid = (pl.cdiv(O, tile_rows),)
        scale = pl.pallas_call(
            softplus_kernel,
            out_shape=jax.ShapeDtypeStruct((O, A), stddev_param.dtype),
            grid=grid,
            in_specs=[pl.BlockSpec((tile_rows, A), lambda i: (i, 0))],
            out_specs=pl.BlockSpec((tile_rows, A), lambda i: (i, 0)),
            compiler_params=pltpu.CompilerParams(
                dimension_semantics=("parallel",),  # shards across TCs on v7x
            ),
            cost_estimate=pl.CostEstimate(
                flops=n,
                transcendentals=2 * n,           # exp + log1p per element
                bytes_accessed=2 * n * itemsize,  # read param + write scale
            ),
        )(stddev_param)

    mean = x  # Normal mean is x, unchanged — never streamed through a kernel.
    return mean, scale


def _ref_scale(stddev_param):
    return jnp.where(
        stddev_param > 20.0,
        stddev_param,
        jnp.log1p(jnp.exp(jnp.minimum(stddev_param, 20.0))),
    )


if __name__ == "__main__":
    # Small shapes consistent with the module: batch=2, noptions=4, action_dim=8
    batch, noptions, action_dim = 2, 4, 8

    key = jax.random.PRNGKey(0)
    kx, kp, kx2, kp2 = jax.random.split(key, 4)

    # --- realistic tiny-parameter case (grid-less whole-array path) ---------
    x = jax.random.normal(kx, (batch, noptions, action_dim), dtype=jnp.float32)
    # nn.Parameter(device.zeros(...)) would be all zeros; use small random
    # values so softplus is non-trivial, still deterministic in-script.
    stddev_param = 0.1 * jax.random.normal(
        kp, (noptions, action_dim), dtype=jnp.float32
    )

    mean, scale = per_option_std_gaussian_forward(x, stddev_param)
    jax.block_until_ready((mean, scale))

    assert mean.shape == (batch, noptions, action_dim)
    assert scale.shape == (noptions, action_dim)
    assert jnp.allclose(mean, x, atol=1e-6)
    assert jnp.allclose(scale, _ref_scale(stddev_param), atol=1e-6)
    # The Normal distribution broadcasts scale against mean exactly like torch:
    assert jnp.broadcast_shapes(mean.shape, scale.shape) == (
        batch,
        noptions,
        action_dim,
    )

    # --- exercise the tiled large-parameter path (multi-step grid, partial
    #     last block) to make sure it also compiles and runs clean -----------
    O2, A2 = 52, 128  # 52 rows / tile_rows=16 -> grid of 4, last block partial
    x2 = jax.random.normal(kx2, (batch, O2, A2), dtype=jnp.float32)
    stddev2 = 0.1 * jax.random.normal(kp2, (O2, A2), dtype=jnp.float32)
    mean2, scale2 = per_option_std_gaussian_forward(x2, stddev2, tile_rows=16)
    jax.block_until_ready((mean2, scale2))
    assert scale2.shape == (O2, A2)
    assert jnp.allclose(mean2, x2, atol=1e-6)
    assert jnp.allclose(scale2, _ref_scale(stddev2), atol=1e-5)

    print("KERNEL_OK")
</pallas_src>

<mosaic_0001>
module attributes {stable_mosaic.version = 11 : i64} {
  func.func @softplus_kernel(%arg0: memref<4x8xf32, #tpu.memory_space<vmem>>, %arg1: memref<4x8xf32, #tpu.memory_space<vmem>>) attributes {dimension_semantics = [], scalar_prefetch = 0 : i64, scratch_operands = 0 : i64, tpu.core_type = #tpu.core_type<tc>} {
    %c0 = arith.constant 0 : index
    %c0_0 = arith.constant 0 : index
    %0 = vector.load %arg0[%c0, %c0_0] : memref<4x8xf32, #tpu.memory_space<vmem>>, vector<4x8xf32>
    %cst = arith.constant 2.000000e+01 : f32
    %1 = vector.broadcast %cst : f32 to vector<4x8xf32>
    %2 = arith.cmpf ogt, %0, %1 : vector<4x8xf32>
    %cst_1 = arith.constant 2.000000e+01 : f32
    %3 = vector.broadcast %cst_1 : f32 to vector<4x8xf32>
    %4 = arith.minimumf %0, %3 : vector<4x8xf32>
    %5 = math.exp %4 : vector<4x8xf32>
    %6 = math.log1p %5 : vector<4x8xf32>
    %7 = arith.select %2, %0, %6 : vector<4x8xi1>, vector<4x8xf32>
    %c0_2 = arith.constant 0 : index
    %c0_3 = arith.constant 0 : index
    %8 = vector.load %arg1[%c0_2, %c0_3] : memref<4x8xf32, #tpu.memory_space<vmem>>, vector<4x8xf32>
    tpu.vector_store %arg1[%c0_2, %c0_3], %7 {strides = array<i32>} : memref<4x8xf32, #tpu.memory_space<vmem>>, vector<4x8xf32>,
    return
  }
}

</mosaic_0001>

<bundles_post_ra>
// kernel: tpu_custom_call.1
= control target key start
LH: loop header
LB: loop body
LE: loop exit
PB: predicated region body
PF: predicated region fallthrough
CT: control target
= control target key end

     0   :  { %6 = vsyncpa [#allocation3], 0  ;;  %s143_s0 = inlined_call_operand.hbm [shape: f32[4,8], index: 0, kind: input, shape index: {}]   ;;  %s144_s1 = inlined_call_operand.hbm [shape: f32[4,8], index: 1, kind: output, shape index: {}]  }
   0x1   :  { %7 = vsyncpa [#allocation4], 0  ;;  %s107_s6 = smov [#allocation2]   ;;  %s59_s10 = scalar_lea.hbm %s143_s0, 64 }
   0x2   :  { %s14_s7 = sshll.u32 %s107_s6, 4  ;;  %p60_p0 = scmp.ne.s32.totalorder %s143_s0, %s59_s10  ;;  %s15_s7 = int_to_ptr.vmem [resolvable:$true] %s14_s7 }
   0x3   :  { %p63_p1 = scmp.lt.u32.totalorder %s59_s10, %s143_s0 }
   0x5   :  { %p65_p2 = pnand %p63_p1, %p60_p0 }
   0x7   :  { %68 = shalt.err (!%p65_p2)
}
   0x8   :  { %s69_s15 = scalar_lea.vmem %s15_s7, 64  ;;  %p74_p4 = scmp.lt.s32.totalorder %s15_s7, %s15_s7 }
   0x9   :  { %p70_p3 = scmp.ne.s32.totalorder %s15_s7, %s69_s15  ;;  %p75_p5 = scmp.lt.s32.totalorder %s69_s15, %s69_s15 }
   0xb   :  { %p76_p6 = por %p75_p5, %p74_p4 }
   0xd   :  { %p77_p7 = pnand %p76_p6, %p70_p3 }
   0xf   :  { %80 = shalt.err (!%p77_p7)
}
  0x10   :  { %17 = dma.hbm_to_vmem [thread:$0]  %s143_s0, 64, %s15_s7, [#allocation3]  }
  0x11   :  { %103 = dma.done.wait [#allocation3], 64  }
  0x12   :  { %104 = vsyncadd [#allocation3], 4294967232  ;;  %v21_v0 = vld [vmem:[#allocation2] sm:$0xf]  ;;  %s108_s18 = smov [#allocation5]   ;;  %vm36_vm2 = vcmask 60416  }
  0x13   :  { %v23_v1 = vmin.f32 %v21_v0, 20.0  ;;  %s44_s19 = sshll.u32 %s108_s18, 4  ;;  %vm22_vm1 = vcmp.gt.f32.partialorder %v21_v0, 20.0  ;;  %s45_s19 = int_to_ptr.vmem [resolvable:$true] %s44_s19 }
  0x14   :  { %s81_s0 = scalar_lea.vmem %s45_s19, 64  ;;  %p86_p9 = scmp.lt.s32.totalorder %s45_s19, %s45_s19 }
  0x15   :  { %v24_v2 = vmul.f32 1.442695, %v23_v1  ;;  %p82_p8 = scmp.ne.s32.totalorder %s45_s19, %s81_s0  ;;  %p87_p10 = scmp.lt.s32.totalorder %s81_s0, %s81_s0 }
  0x17   :  { %55 = vpow2.f32 %v24_v2  ;;  %p88_p11 = por %p87_p10, %p86_p9 }
  0x19   :  { %p89_p12 = pnand %p88_p11, %p82_p8 }
  0x21   :  { %v56_v3 = vpop.eup %55 }
  0x22   :  { %v26_v4 = vadd.f32 1.0, %v56_v3  ;;  %v29_v5 = vmul.f32 -0.5, %v56_v3  ;;  %v32_v7 = vand.u32 2147483647, %v56_v3 }
  0x24   :  { %57 = vlog2.f32 %v26_v4  ;;  %v30_v6 = vadd.f32 1.0, %v29_v5  ;;  %vm33_vm0 = vcmp.lt.f32.partialorder %v32_v7, 0.0004427343 }
  0x26   :  { %v31_v8 = vmul.f32 %v56_v3, %v30_v6 }
  0x2e   :  { %v58_v9 = vpop.eup %57 }
  0x2f   :  { %v28_v10 = vmul.f32 0.6931472, %v58_v9 }
  0x31   :  { %v34_v11 = vsel %vm33_vm0, %v31_v8, %v28_v10 }
  0x32   :  { %v35_v12 = vsel %vm22_vm1, %v21_v0, %v34_v11 }
  0x33   :  { %37 = vst.msk [vmem:[#allocation5] sm:$0xf] %vm36_vm2, %v35_v12 }
  0x34   :  { %92 = shalt.err (!%p89_p12)
}
  0x35   :  { %s93_s22 = scalar_lea.hbm %s144_s1, 64 }
  0x36   :  { %p94_p13 = scmp.ne.s32.totalorder %s144_s1, %s93_s22  ;;  %p97_p0 = scmp.lt.u32.totalorder %s93_s22, %s144_s1 }
  0x38   :  { %p99_p1 = pnand %p97_p0, %p94_p13 }
  0x3a   :  { %102 = shalt.err (!%p99_p1)
}
  0x3b   :  { %47 = dma.vmem_to_hbm [thread:$0]  %s45_s19, 64, %s144_s1, [#allocation4]  }
  0x3c   :  { %105 = dma.done.wait [#allocation4], 64  }
  0x3d   :  { %106 = vsyncadd [#allocation4], 4294967232 }
  0x3e   :  { %51 = vsyncpa [#allocation3], 1 }
  0x3f   :  { %52 = vsyncpa [#allocation4], 1 }

</bundles_post_ra>
